<compile_context>
chip_gen: v6e
topology: v6e:2x2x1
jax: 0.10.0
libtpu: 0.0.40
codegen_flags: <defaults>
</compile_context>

<pallas_src>
import jax
import jax.numpy as jnp
from jax.experimental import pallas as pl
from jax.experimental.pallas import tpu as pltpu

BN_EPS = 1e-5
NORM_EPS = 1e-16
LANE = 128
SUBLANE = 8


def _round_up(x, m):
    return (x + m - 1) // m * m


# --------------------------------------------------------------------------- #
# Kernel
# --------------------------------------------------------------------------- #
def mlp_kernel(x_ref,
               w1_ref, b1_ref,
               w2_ref, b2_ref,
               w3_ref, b3_ref,
               alphas_ref,
               o_ref):
    """Fused MLP tile: Linear -> PReLU -> Linear(BN1 folded) -> PReLU ->
    Linear(BN2 folded) -> row-wise L2 normalization.

    All math is row-local (no cross-row reductions), so ragged/garbage rows in
    the last batch block are safe: their stores are masked by Pallas.
    """
    a1 = alphas_ref[0]          # PReLU shared parameter, layer 1 (SMEM scalar)
    a2 = alphas_ref[1]          # PReLU shared parameter, layer 2
    cdt = w1_ref.dtype          # MXU input dtype (bf16 by default, f32 for checks)

    x = x_ref[...]              # (tile_b, D_in), true lane width, any float dtype

    # Linear(in, hid) + bias  (accumulate in f32 on the MXU)
    h = jnp.dot(x.astype(cdt), w1_ref[...],
                preferred_element_type=jnp.float32) + b1_ref[...]
    # PReLU (f32 elementwise)
    h = jnp.where(h > 0, h, a1 * h)

    # Linear(hid, hid) with BN1 folded into (w2', b2')
    h = jnp.dot(h.astype(cdt), w2_ref[...],
                preferred_element_type=jnp.float32) + b2_ref[...]
    # PReLU  (Dropout is identity in eval mode)
    h = jnp.where(h > 0, h, a2 * h)

    # Linear(hid, out) with BN2 folded into (w3', b3')
    out = jnp.dot(h.astype(cdt), w3_ref[...],
                  preferred_element_type=jnp.float32) + b3_ref[...]

    # Row-wise L2 normalization.  Padded output columns are exactly 0 (weights
    # zero-padded), so the reduction over the lane-padded width is exact.
    sumsq = jnp.sum(out * out, axis=1, keepdims=True)
    o_ref[...] = (out * jax.lax.rsqrt(sumsq + NORM_EPS)).astype(o_ref.dtype)


# --------------------------------------------------------------------------- #
# Wrapper: BN folding, weight padding, generation-aware tiling
# --------------------------------------------------------------------------- #
def fold_and_pad_params(p, compute_dtype):
    """Fold eval-mode BatchNorm into the following Linear; zero-pad only the
    hidden/output feature dims of the weights to multiples of 128."""
    D_in, H = p["w1"].shape
    D_out = p["w3"].shape[1]

    # BN(h) = h * s + t  with  s = g * rsqrt(v + eps),  t = be - m * s
    s1 = p["g1"] * jax.lax.rsqrt(p["v1"] + BN_EPS)    # (1, H)
    t1 = p["be1"] - p["m1"] * s1
    s2 = p["g2"] * jax.lax.rsqrt(p["v2"] + BN_EPS)
    t2 = p["be2"] - p["m2"] * s2

    # BN(h) @ W + b  ==  h @ (s[:, None] * W) + (t @ W + b)
    w1f, b1f = p["w1"], p["b1"]
    w2f = s1.reshape(-1, 1) * p["w2"]
    b2f = t1 @ p["w2"] + p["b2"]
    w3f = s2.reshape(-1, 1) * p["w3"]
    b3f = t2 @ p["w3"]                                # original layer has no bias

    Hp = _round_up(H, LANE)
    Dp_out = _round_up(D_out, LANE)

    def pad2(a, rows, cols):
        return jnp.pad(a, ((0, rows - a.shape[0]), (0, cols - a.shape[1])))

    folded = {
        # Weights in the MXU compute dtype (bf16 default); biases stay f32
        # (added after the f32 accumulation).
        "w1": pad2(w1f, D_in, Hp).astype(compute_dtype),   # input dim NOT padded
        "b1": pad2(b1f, 1, Hp).astype(jnp.float32),
        "w2": pad2(w2f, Hp, Hp).astype(compute_dtype),
        "b2": pad2(b2f, 1, Hp).astype(jnp.float32),
        "w3": pad2(w3f, Hp, Dp_out).astype(compute_dtype),
        "b3": pad2(b3f, 1, Dp_out).astype(jnp.float32),
        "alphas": jnp.concatenate(
            [p["a1"].reshape(-1), p["a2"].reshape(-1)]).astype(jnp.float32),
    }
    return folded, (D_in, H, D_out, Hp, Dp_out)


def _select_tile_and_vmem(B, D_in, Hp, Dp_out, w_itemsize, tile_b):
    """Generation-aware batch tile and VMEM budget."""
    try:
        vmem_cap = int(pltpu.get_tpu_info().vmem_capacity_bytes)
    except Exception:
        vmem_cap = 64 * 1024 * 1024            # conservative (v7x-sized) fallback
    budget = int(vmem_cap * 0.75)              # ~25% headroom for the compiler

    # Resident, single-buffered weights (Buffered(1)) + f32 biases.
    weight_bytes = (w_itemsize * (D_in * Hp + Hp * Hp + Hp * Dp_out)
                    + 4 * (2 * Hp + Dp_out))

    # Per-row VMEM: double-buffered x/out tiles + live f32 intermediates
    # + bf16 cast copies fed to the MXU.
    per_row = (2 * 4 * D_in                       # x, double-buffered, f32
               + 2 * 4 * Dp_out                   # out, double-buffered, f32
               + 4 * (2 * Hp + Dp_out)            # live f32 h / out
               + w_itemsize * (D_in + Hp))        # casts for the dots

    if tile_b is None:
        avail = max(budget - weight_bytes, 0)
        tile_b = max(SUBLANE, min(int(avail // max(per_row, 1)), 2048))
        # Prefer >=2 grid steps when B allows it, so the "parallel" batch axis
        # shards across TensorCores (v7x megacore) and x/out DMAs pipeline.
        if B > SUBLANE:
            tile_b = min(tile_b, _round_up(pl.cdiv(B, 2), SUBLANE))
        tile_b = min(tile_b, _round_up(B, SUBLANE))
    tile_b = int(tile_b)
    if tile_b >= 2 * LANE:
        tile_b = (tile_b // LANE) * LANE          # fill the MXU M dim (v5e 4x128)
    tile_b = max(SUBLANE, _round_up(tile_b, SUBLANE))

    need = weight_bytes + tile_b * per_row + (2 << 20)
    vmem_limit = int(min(max(need, 32 * 1024 * 1024), max(budget, 32 * 1024 * 1024)))
    return tile_b, vmem_limit


def mlp_forward(x, params, *, tile_b=None, compute_dtype=jnp.bfloat16):
    B, D_in = x.shape
    fp, (d_in, _H, D_out, Hp, Dp_out) = fold_and_pad_params(params, compute_dtype)
    assert d_in == D_in

    w_itemsize = jnp.dtype(compute_dtype).itemsize
    tile_b, vmem_limit = _select_tile_and_vmem(B, D_in, Hp, Dp_out,
                                               w_itemsize, tile_b)
    grid = (pl.cdiv(B, tile_b),)   # ragged last block handled by masked stores

    # Grid-invariant blocks: constant index_map + single buffer (never re-fetched).
    resident = lambda shape: pl.BlockSpec(shape, lambda i: (0, 0),
                                          pipeline_mode=pl.Buffered(1))
    in_specs = [
        # x at its true lane width (last block dim == full array dim); Mosaic
        # pads internally for the MXU at VMEM speed, far cheaper than HBM bytes.
        pl.BlockSpec((tile_b, D_in), lambda i: (i, 0)),
        resident((D_in, Hp)), resident((1, Hp)),          # w1, b1
        resident((Hp, Hp)),   resident((1, Hp)),          # w2' (BN1 folded), b2'
        resident((Hp, Dp_out)), resident((1, Dp_out)),    # w3' (BN2 folded), b3'
        pl.BlockSpec(memory_space=pltpu.MemorySpace.SMEM),  # PReLU alphas (2,)
    ]
    out_spec = pl.BlockSpec((tile_b, Dp_out), lambda i: (i, 0))

    out_p = pl.pallas_call(
        mlp_kernel,
        out_shape=jax.ShapeDtypeStruct((B, Dp_out), jnp.float32),
        grid_spec=pltpu.PrefetchScalarGridSpec(
            num_scalar_prefetch=0,
            grid=grid,
            in_specs=in_specs,
            out_specs=out_spec,
        ),
        compiler_params=pltpu.CompilerParams(
            dimension_semantics=("parallel",),   # independent batch tiles
            vmem_limit_bytes=vmem_limit,
        ),
    )(x,
      fp["w1"], fp["b1"],
      fp["w2"], fp["b2"],
      fp["w3"], fp["b3"],
      fp["alphas"])

    # Only wrapper op left: trim the (small) lane padding on the output columns.
    return out_p[:, :D_out] if Dp_out != D_out else out_p


# --------------------------------------------------------------------------- #
# Pure-JAX reference (un-folded, un-padded f32 math) and param init
# --------------------------------------------------------------------------- #
def mlp_reference(x, p):
    h = x @ p["w1"] + p["b1"]
    h = jnp.where(h > 0, h, p["a1"] * h)
    h = (h - p["m1"]) / jnp.sqrt(p["v1"] + BN_EPS) * p["g1"] + p["be1"]
    h = h @ p["w2"] + p["b2"]
    h = jnp.where(h > 0, h, p["a2"] * h)
    h = (h - p["m2"]) / jnp.sqrt(p["v2"] + BN_EPS) * p["g2"] + p["be2"]
    out = h @ p["w3"]
    return out / (jnp.linalg.norm(out, axis=1, keepdims=True) + NORM_EPS)


def init_params(key, d_in, hid, d_out):
    ks = jax.random.split(key, 8)

    def xavier(k, fan_in, fan_out):
        std = (2.0 / (fan_in + fan_out)) ** 0.5
        return std * jax.random.normal(k, (fan_in, fan_out), jnp.float32)

    def bn(k):
        km, kv = jax.random.split(k)
        return {
            "g": 1.0 + 0.1 * jax.random.normal(km, (1, hid), jnp.float32),
            "be": 0.1 * jax.random.normal(kv, (1, hid), jnp.float32),
            "m": 0.05 * jax.random.normal(km, (1, hid), jnp.float32),
            "v": 1.0 + 0.1 * jax.random.uniform(kv, (1, hid), jnp.float32),
        }

    bn1, bn2 = bn(ks[3]), bn(ks[4])
    return {
        "w1": xavier(ks[0], d_in, hid),
        "b1": jnp.zeros((1, hid), jnp.float32),
        "a1": jnp.full((1, 1), 0.25, jnp.float32),      # PyTorch PReLU default
        "g1": bn1["g"], "be1": bn1["be"], "m1": bn1["m"], "v1": bn1["v"],
        "w2": xavier(ks[1], hid, hid),
        "b2": jnp.zeros((1, hid), jnp.float32),
        "a2": jnp.full((1, 1), 0.25, jnp.float32),
        "g2": bn2["g"], "be2": bn2["be"], "m2": bn2["m"], "v2": bn2["v"],
        "w3": xavier(ks[2], hid, d_out),
    }


if __name__ == "__main__":
    key = jax.random.PRNGKey(0)

    # --- primary small test (shapes consistent with the module's forward) ---
    B, D_IN, HID, D_OUT = 8, 16, 32, 16
    kx, kp, kx2, kp2 = jax.random.split(key, 4)
    x = jax.random.normal(kx, (B, D_IN), jnp.float32)
    params = init_params(kp, D_IN, HID, D_OUT)
    ref = mlp_reference(x, params)

    # f32 compute path: validates fusion / BN folding / padding exactly.
    out_f32 = jax.block_until_ready(mlp_forward(x, params,
                                                compute_dtype=jnp.float32))
    assert out_f32.shape == (B, D_OUT)
    assert jnp.allclose(out_f32, ref, atol=1e-4, rtol=1e-4), "f32 mismatch"

    # bf16 (default, MXU-native) path: f32 accumulation, looser tolerance.
    out_bf16 = jax.block_until_ready(mlp_forward(x, params))
    assert out_bf16.shape == (B, D_OUT)
    assert jnp.allclose(out_bf16, ref, atol=5e-2, rtol=5e-2), "bf16 mismatch"

    # --- second test: ragged batch (70 rows, tile 32 -> grid of 3 with a
    #     masked ragged last block) + non-128 feature dims ---
    B2, D_IN2, HID2, D_OUT2 = 70, 20, 48, 24
    x2 = jax.random.normal(kx2, (B2, D_IN2), jnp.float32)
    params2 = init_params(kp2, D_IN2, HID2, D_OUT2)
    ref2 = mlp_reference(x2, params2)

    out2_f32 = jax.block_until_ready(mlp_forward(x2, params2, tile_b=32,
                                                 compute_dtype=jnp.float32))
    assert out2_f32.shape == (B2, D_OUT2)
    assert jnp.allclose(out2_f32, ref2, atol=1e-4, rtol=1e-4), "f32 mismatch (2)"

    out2_bf16 = jax.block_until_ready(mlp_forward(x2, params2, tile_b=32))
    assert out2_bf16.shape == (B2, D_OUT2)
    assert jnp.allclose(out2_bf16, ref2, atol=5e-2, rtol=5e-2), "bf16 mismatch (2)"

    print("KERNEL_OK")
</pallas_src>

<mosaic_0001>
module attributes {stable_mosaic.version = 11 : i64} {
  func.func @mlp_kernel(%arg0: i32, %arg1: memref<8x16xf32, #tpu.memory_space<vmem>>, %arg2: memref<16x128xf32, #tpu.memory_space<vmem>>, %arg3: memref<1x128xf32, #tpu.memory_space<vmem>>, %arg4: memref<128x128xf32, #tpu.memory_space<vmem>>, %arg5: memref<1x128xf32, #tpu.memory_space<vmem>>, %arg6: memref<128x128xf32, #tpu.memory_space<vmem>>, %arg7: memref<1x128xf32, #tpu.memory_space<vmem>>, %arg8: memref<2xf32, #tpu.memory_space<smem>>, %arg9: memref<8x128xf32, #tpu.memory_space<vmem>>) attributes {dimension_semantics = [#tpu.dimension_semantics<parallel>], iteration_bounds = array<i64: 1>, scalar_prefetch = 0 : i64, scratch_operands = 0 : i64, tpu.core_type = #tpu.core_type<tc>, window_params = [{transform_indices = @transform_0, window_bounds = array<i64: 8, 16>}, {pipeline_mode = #tpu.pipeline_mode<synchronous>, transform_indices = @transform_1, window_bounds = array<i64: 16, 128>}, {pipeline_mode = #tpu.pipeline_mode<synchronous>, transform_indices = @transform_2, window_bounds = array<i64: 1, 128>}, {pipeline_mode = #tpu.pipeline_mode<synchronous>, transform_indices = @transform_3, window_bounds = array<i64: 128, 128>}, {pipeline_mode = #tpu.pipeline_mode<synchronous>, transform_indices = @transform_4, window_bounds = array<i64: 1, 128>}, {pipeline_mode = #tpu.pipeline_mode<synchronous>, transform_indices = @transform_5, window_bounds = array<i64: 128, 128>}, {pipeline_mode = #tpu.pipeline_mode<synchronous>, transform_indices = @transform_6, window_bounds = array<i64: 1, 128>}, {transform_indices = @transform_7, window_bounds = array<i64: 2>}, {transform_indices = @transform_8, window_bounds = array<i64: 8, 128>}]} {
    %c0 = arith.constant 0 : index
    %0 = memref.load %arg8[%c0] : memref<2xf32, #tpu.memory_space<smem>>
    %c1 = arith.constant 1 : index
    %1 = memref.load %arg8[%c1] : memref<2xf32, #tpu.memory_space<smem>>
    %c0_0 = arith.constant 0 : index
    %c0_1 = arith.constant 0 : index
    %2 = vector.load %arg1[%c0_0, %c0_1] : memref<8x16xf32, #tpu.memory_space<vmem>>, vector<8x16xf32>
    %c0_2 = arith.constant 0 : index
    %c0_3 = arith.constant 0 : index
    %3 = vector.load %arg2[%c0_2, %c0_3] : memref<16x128xf32, #tpu.memory_space<vmem>>, vector<16x128xf32>
    %cst = arith.constant dense<0.000000e+00> : vector<8x128xf32>
    %4 = tpu.matmul %2, %3, %cst {dimension_numbers = #tpu.dot_dimension_numbers<[1], [0], [0], [1], [0, 0, 1, 1], [], []>} : vector<8x16xf32>, vector<16x128xf32>, vector<8x128xf32> -> vector<8x128xf32>
    %c0_4 = arith.constant 0 : index
    %c0_5 = arith.constant 0 : index
    %5 = vector.load %arg3[%c0_4, %c0_5] : memref<1x128xf32, #tpu.memory_space<vmem>>, vector<1x128xf32>
    %6 = vector.broadcast %5 : vector<1x128xf32> to vector<8x128xf32>
    %7 = arith.addf %4, %6 : vector<8x128xf32>
    %cst_6 = arith.constant 0.000000e+00 : f32
    %8 = vector.broadcast %cst_6 : f32 to vector<8x128xf32>
    %9 = arith.cmpf ogt, %7, %8 : vector<8x128xf32>
    %10 = vector.broadcast %0 : f32 to vector<8x128xf32>
    %11 = arith.mulf %10, %7 : vector<8x128xf32>
    %12 = arith.select %9, %7, %11 : vector<8x128xi1>, vector<8x128xf32>
    %c0_7 = arith.constant 0 : index
    %c0_8 = arith.constant 0 : index
    %13 = vector.load %arg4[%c0_7, %c0_8] : memref<128x128xf32, #tpu.memory_space<vmem>>, vector<128x128xf32>
    %cst_9 = arith.constant dense<0.000000e+00> : vector<8x128xf32>
    %14 = tpu.matmul %12, %13, %cst_9 {dimension_numbers = #tpu.dot_dimension_numbers<[1], [0], [0], [1], [0, 0, 1, 1], [], []>} : vector<8x128xf32>, vector<128x128xf32>, vector<8x128xf32> -> vector<8x128xf32>
    %c0_10 = arith.constant 0 : index
    %c0_11 = arith.constant 0 : index
    %15 = vector.load %arg5[%c0_10, %c0_11] : memref<1x128xf32, #tpu.memory_space<vmem>>, vector<1x128xf32>
    %16 = vector.broadcast %15 : vector<1x128xf32> to vector<8x128xf32>
    %17 = arith.addf %14, %16 : vector<8x128xf32>
    %cst_12 = arith.constant 0.000000e+00 : f32
    %18 = vector.broadcast %cst_12 : f32 to vector<8x128xf32>
    %19 = arith.cmpf ogt, %17, %18 : vector<8x128xf32>
    %20 = vector.broadcast %1 : f32 to vector<8x128xf32>
    %21 = arith.mulf %20, %17 : vector<8x128xf32>
    %22 = arith.select %19, %17, %21 : vector<8x128xi1>, vector<8x128xf32>
    %c0_13 = arith.constant 0 : index
    %c0_14 = arith.constant 0 : index
    %23 = vector.load %arg6[%c0_13, %c0_14] : memref<128x128xf32, #tpu.memory_space<vmem>>, vector<128x128xf32>
    %cst_15 = arith.constant dense<0.000000e+00> : vector<8x128xf32>
    %24 = tpu.matmul %22, %23, %cst_15 {dimension_numbers = #tpu.dot_dimension_numbers<[1], [0], [0], [1], [0, 0, 1, 1], [], []>} : vector<8x128xf32>, vector<128x128xf32>, vector<8x128xf32> -> vector<8x128xf32>
    %c0_16 = arith.constant 0 : index
    %c0_17 = arith.constant 0 : index
    %25 = vector.load %arg7[%c0_16, %c0_17] : memref<1x128xf32, #tpu.memory_space<vmem>>, vector<1x128xf32>
    %26 = vector.broadcast %25 : vector<1x128xf32> to vector<8x128xf32>
    %27 = arith.addf %24, %26 : vector<8x128xf32>
    %28 = arith.mulf %27, %27 : vector<8x128xf32>
    %cst_18 = arith.constant dense<0.000000e+00> : vector<8xf32>
    %29 = vector.multi_reduction <add>, %28, %cst_18 [1] : vector<8x128xf32> to vector<8xf32>
    %30 = vector.shape_cast %29 : vector<8xf32> to vector<8x1xf32>
    %cst_19 = arith.constant 1.000000e-16 : f32
    %31 = vector.broadcast %cst_19 : f32 to vector<8x1xf32>
    %32 = arith.addf %30, %31 : vector<8x1xf32>
    %33 = math.rsqrt %32 : vector<8x1xf32>
    %34 = vector.broadcast %33 : vector<8x1xf32> to vector<8x128xf32>
    %35 = arith.mulf %27, %34 : vector<8x128xf32>
    %c0_20 = arith.constant 0 : index
    %c0_21 = arith.constant 0 : index
    %36 = vector.load %arg9[%c0_20, %c0_21] : memref<8x128xf32, #tpu.memory_space<vmem>>, vector<8x128xf32>
    tpu.vector_store %arg9[%c0_20, %c0_21], %35 {strides = array<i32>} : memref<8x128xf32, #tpu.memory_space<vmem>>, vector<8x128xf32>,
    return
  }
  func.func @transform_0(%arg0: i32) -> (i32, i32) {
    %c0_i32 = arith.constant 0 : i32
    %c0_i32_0 = arith.constant 0 : i32
    return %arg0, %c0_i32 : i32, i32
  }
  func.func @transform_1(%arg0: i32) -> (i32, i32) {
    %c0_i32 = arith.constant 0 : i32
    %c0_i32_0 = arith.constant 0 : i32
    %c0_i32_1 = arith.constant 0 : i32
    return %c0_i32, %c0_i32_0 : i32, i32
  }
  func.func @transform_2(%arg0: i32) -> (i32, i32) {
    %c0_i32 = arith.constant 0 : i32
    %c0_i32_0 = arith.constant 0 : i32
    %c0_i32_1 = arith.constant 0 : i32
    return %c0_i32, %c0_i32_0 : i32, i32
  }
  func.func @transform_3(%arg0: i32) -> (i32, i32) {
    %c0_i32 = arith.constant 0 : i32
    %c0_i32_0 = arith.constant 0 : i32
    %c0_i32_1 = arith.constant 0 : i32
    return %c0_i32, %c0_i32_0 : i32, i32
  }
  func.func @transform_4(%arg0: i32) -> (i32, i32) {
    %c0_i32 = arith.constant 0 : i32
    %c0_i32_0 = arith.constant 0 : i32
    %c0_i32_1 = arith.constant 0 : i32
    return %c0_i32, %c0_i32_0 : i32, i32
  }
  func.func @transform_5(%arg0: i32) -> (i32, i32) {
    %c0_i32 = arith.constant 0 : i32
    %c0_i32_0 = arith.constant 0 : i32
    %c0_i32_1 = arith.constant 0 : i32
    return %c0_i32, %c0_i32_0 : i32, i32
  }
  func.func @transform_6(%arg0: i32) -> (i32, i32) {
    %c0_i32 = arith.constant 0 : i32
    %c0_i32_0 = arith.constant 0 : i32
    %c0_i32_1 = arith.constant 0 : i32
    return %c0_i32, %c0_i32_0 : i32, i32
  }
  func.func @transform_7(%arg0: i32) -> i32 {
    %c0_i32 = arith.constant 0 : i32
    %c0_i32_0 = arith.constant 0 : i32
    return %c0_i32 : i32
  }
  func.func @transform_8(%arg0: i32) -> (i32, i32) {
    %c0_i32 = arith.constant 0 : i32
    %c0_i32_0 = arith.constant 0 : i32
    return %arg0, %c0_i32 : i32, i32
  }
}

</mosaic_0001>

<bundles_post_ra>
// kernel: tpu_custom_call.1
= control target key start
LH: loop header
LB: loop body
LE: loop exit
PB: predicated region body
PF: predicated region fallthrough
CT: control target
= control target key end

     0   :  { %13 = vsyncpa [#allocation3], 0  ;;  %s785_s0 = inlined_call_operand.hbm [shape: f32[8,16], index: 0, kind: input, shape index: {}]   ;;  %s786_s1 = inlined_call_operand.hbm [shape: f32[16,128], index: 1, kind: input, shape index: {}]   ;;  %s787_s2 = inlined_call_operand.vmem [shape: f32[1,128], index: 2, kind: input, shape index: {}]   ;;  %s788_s3 = inlined_call_operand.hbm [shape: f32[128,128], index: 3, kind: input, shape index: {}]   ;;  %s789_s4 = inlined_call_operand.vmem [shape: f32[1,128], index: 4, kind: input, shape index: {}]   ;;  %s790_s5 = inlined_call_operand.hbm [shape: f32[128,128], index: 5, kind: input, shape index: {}]   ;;  %s791_s6 = inlined_call_operand.vmem [shape: f32[1,128], index: 6, kind: input, shape index: {}]   ;;  %s792_s7 = inlined_call_operand.vmem [shape: f32[2], index: 7, kind: input, shape index: {}]   ;;  %s793_s8 = inlined_call_operand.hbm [shape: f32[8,128], index: 8, kind: output, shape index: {}]  }
   0x1   :  { %14 = vsyncpa [#allocation7], 0 }
   0x2   :  { %15 = vsyncpa [#allocation10], 0 }
   0x3   :  { %16 = vsyncpa [#allocation5], 0 }
   0x4   :  { %17 = vsyncpa [#allocation4], 0  ;;  %s654_s27 = smov [#allocation6]  }
   0x5   :  { %s33_s28 = sshll.u32 %s654_s27, 4  ;;  %s34_s28 = int_to_ptr.vmem [resolvable:$true] %s33_s28 }
   0x6   :  { %s540_s29 = scalar_lea.vmem %s34_s28, 256  ;;  %p545_p1 = scmp.lt.s32.totalorder %s34_s28, %s34_s28 }
   0x7   :  { %p541_p0 = scmp.ne.s32.totalorder %s34_s28, %s540_s29  ;;  %p546_p2 = scmp.lt.s32.totalorder %s540_s29, %s540_s29 }
   0x9   :  { %p547_p3 = por %p546_p2, %p545_p1 }
   0xb   :  { %p548_p4 = pnand %p547_p3, %p541_p0 }
   0xd   :  { %551 = shalt.err (!%p548_p4)
}
   0xe   :  { %s655_s30 = smov 128   ;;  %s656_s9 = smov 8  }
   0xf   :  { %39 = dma.hbm_to_vmem [thread:$0]  %s786_s1, 256, %s34_s28, [#allocation7], %s655_s30, %s655_s30, %s656_s9  }
  0x10   :  { %s657_s12 = smov [#allocation2]   ;;  %s658_s14 = smov [#allocation8]  }
  0x11   :  { %s24_s13 = sshll.u32 %s657_s12, 4  ;;  %s47_s15 = sshll.u32 %s658_s14, 4  ;;  %s25_s13 = int_to_ptr.vmem [resolvable:$true] %s24_s13  ;;  %s48_s15 = int_to_ptr.vmem [resolvable:$true] %s47_s15 }
  0x12   :  { %s560_s16 = scalar_lea.vmem %s25_s13, 128  ;;  %p565_p6 = scmp.lt.s32.totalorder %s25_s13, %s25_s13 }
  0x13   :  { %p561_p5 = scmp.ne.s32.totalorder %s25_s13, %s560_s16  ;;  %p566_p7 = scmp.lt.s32.totalorder %s560_s16, %s560_s16 }
  0x15   :  { %p567_p8 = por %p566_p7, %p565_p6 }
  0x17   :  { %p568_p9 = pnand %p567_p8, %p561_p5 }
  0x19   :  { %571 = shalt.err (!%p568_p9)
}
  0x1a   :  { %27 = dma.hbm_to_vmem [thread:$0]  %s785_s0, 128, %s25_s13, [#allocation3]  }
  0x1b   :  { %s580_s19 = scalar_lea.vmem %s48_s15, 2048  ;;  %p585_p11 = scmp.lt.s32.totalorder %s48_s15, %s48_s15 }
  0x1c   :  { %p581_p10 = scmp.ne.s32.totalorder %s48_s15, %s580_s19  ;;  %p586_p12 = scmp.lt.s32.totalorder %s580_s19, %s580_s19 }
  0x1e   :  { %p587_p13 = por %p586_p12, %p585_p11 }
  0x20   :  { %p588_p0 = pnand %p587_p13, %p581_p10 }
  0x22   :  { %591 = shalt.err (!%p588_p0)
}
  0x23   :  { %53 = dma.hbm_to_vmem [thread:$0]  %s788_s3, 2048, %s48_s15, [#allocation7], %s655_s30, %s655_s30, %s656_s9  }
  0x24   :  { %s659_s21 = smov [#allocation9]   ;;  %s76_s0 = sshll.u32 %s792_s7, 4  ;;  %s77_s0 = int_to_ptr.vmem [resolvable:$true] %s76_s0 }
  0x25   :  { %s61_s22 = sshll.u32 %s659_s21, 4  ;;  %s62_s22 = int_to_ptr.vmem [resolvable:$true] %s61_s22 }
  0x26   :  { %s600_s25 = scalar_lea.vmem %s62_s22, 2048  ;;  %p605_p2 = scmp.lt.s32.totalorder %s62_s22, %s62_s22 }
  0x27   :  { %p601_p1 = scmp.ne.s32.totalorder %s62_s22, %s600_s25  ;;  %p606_p3 = scmp.lt.s32.totalorder %s600_s25, %s600_s25 }
  0x29   :  { %p607_p4 = por %p606_p3, %p605_p2 }
  0x2b   :  { %p608_p5 = pnand %p607_p4, %p601_p1 }
  0x2d   :  { %611 = shalt.err (!%p608_p5)
}
  0x2e   :  { %67 = dma.hbm_to_vmem [thread:$0]  %s790_s5, 2048, %s62_s22, [#allocation10], %s655_s30, %s655_s30, %s656_s9  }
  0x2f   :  { %s612_s27 = scalar_lea.vmem %s77_s0, 16  ;;  %p617_p7 = scmp.lt.s32.totalorder %s77_s0, %s77_s0 }
  0x30   :  { %p613_p6 = scmp.ne.s32.totalorder %s77_s0, %s612_s27  ;;  %p618_p8 = scmp.lt.s32.totalorder %s612_s27, %s612_s27 }
  0x32   :  { %p619_p9 = por %p618_p8, %p617_p7 }
  0x34   :  { %p620_p10 = pnand %p619_p9, %p613_p6 }
  0x36   :  { %623 = shalt.err (!%p620_p10)
}
  0x37   :  { %s660_s7 = smov [#allocation11]  }
  0x38   :  { %79 = dma.vmem_to_smem %s77_s0, 16, %s660_s7, [#allocation5]  }
  0x39   :  { %644 = dma.done.wait [#allocation3], 128  }
  0x3a   :  { %645 = vsyncadd [#allocation3], 4294967168 }
  0x3b   :  { %646 = dma.done.wait [#allocation7], 2304  }
  0x3c   :  { %647 = vsyncadd [#allocation7], 4294964992 }
  0x3d   :  { %648 = dma.done.wait [#allocation10], 2048  }
  0x3e   :  { %649 = vsyncadd [#allocation10], 4294965248 }
  0x3f   :  { %650 = dma.done.wait [#allocation5], 16  }
  0x40   :  { %651 = vsyncadd [#allocation5], 4294967280 }
  0x41   :  { %95 = sfence }
  0x42   :  { %v100_v0 = vld [vmem:[#allocation6 + $0x8] sm:$0xff]  ;;  %v661_v1 = vmov 0.0   ;;  %v99_v2 = vld [vmem:[#allocation6] sm:$0xff]  ;;  %vm662_vm0 = vmmov 0   ;;  %v98_v4 = vld [vmem:[#allocation2] sm:$0xff]  ;;  %vm108_vm1 = vcmask 130048  }
  0x43   :  { %443 = vmatprep.subr.mxu0 %v661_v1  ;;  %447 = vmatprep.mubr.msk.f32.mxu0 %vm662_vm0, %v661_v1  ;;  %v201_v3 = vld [vmem:[#allocation8 + $0x78] sm:$0xff]  ;;  %v200_v5 = vld [vmem:[#allocation8 + $0x70] sm:$0xff]  ;;  %v199_v6 = vld [vmem:[#allocation8 + $0x68] sm:$0xff]  ;;  %s96_s5 = sld [smem:[#allocation11]] }
  0x44   :  { %444 = vmatpush3.msra.mxu0 %v100_v0  ;;  %450 = vmatprep.subr.mxu1 %v661_v1  ;;  %v198_v7 = vld [vmem:[#allocation8 + $0x60] sm:$0xff]  ;;  %v197_v8 = vld [vmem:[#allocation8 + $0x58] sm:$0xff]  ;;  %v196_v9 = vld [vmem:[#allocation8 + $0x50] sm:$0xff]  ;;  %s401_s30 = sld [smem:[#allocation11 + $0x1]] }
  0x45   :  { %445 = vmatprep.subr.mxu0 %v661_v1  ;;  %451 = vmatpush3.msra.mxu1 %v201_v3  ;;  %v195_v10 = vld [vmem:[#allocation8 + $0x48] sm:$0xff]  ;;  %v194_v11 = vld [vmem:[#allocation8 + $0x40] sm:$0xff]  ;;  %v193_v12 = vld [vmem:[#allocation8 + $0x38] sm:$0xff] }
  0x46   :  { %446 = vmatpush3.msra.mxu0 %v99_v2  ;;  %452 = vmatprep.subr.mxu1 %v661_v1  ;;  %v192_v13 = vld [vmem:[#allocation8 + $0x30] sm:$0xff]  ;;  %v191_v14 = vld [vmem:[#allocation8 + $0x28] sm:$0xff]  ;;  %v190_v15 = vld [vmem:[#allocation8 + $0x20] sm:$0xff] }
  0x47   :  { %448 = vmatmul.mubr.msk.f32.vlgmr.msra.gmra.mxu0 %vm108_vm1, %v98_v4  ;;  %453 = vmatpush3.msra.mxu1 %v200_v5  ;;  %v189_v16 = vld [vmem:[#allocation8 + $0x18] sm:$0xff]  ;;  %v188_v17 = vld [vmem:[#allocation8 + $0x10] sm:$0xff]  ;;  %v187_v18 = vld [vmem:[#allocation8 + $0x8] sm:$0xff] }
  0x48   :  { %454 = vmatprep.subr.mxu1 %v661_v1  ;;  %482 = vmatprep.mubr.msk.f32.mxu1 %vm662_vm0, %v661_v1  ;;  %v186_v19 = vld [vmem:[#allocation8] sm:$0xff]  ;;  %v298_v20 = vld [vmem:[#allocation9 + $0x78] sm:$0xff]  ;;  %v297_v21 = vld [vmem:[#allocation9 + $0x70] sm:$0xff] }
  0x49   :  { %455 = vmatpush3.msra.mxu1 %v199_v6  ;;  %485 = vmatprep.subr.mxu0 %v661_v1  ;;  %v296_v22 = vld [vmem:[#allocation9 + $0x68] sm:$0xff]  ;;  %v295_v23 = vld [vmem:[#allocation9 + $0x60] sm:$0xff]  ;;  %v294_v24 = vld [vmem:[#allocation9 + $0x58] sm:$0xff]  ;;  %v183_v35 = vstv %s96_s5 }
  0x4a   :  { %456 = vmatprep.subr.mxu1 %v661_v1  ;;  %517 = vmatprep.mubr.msk.f32.mxu0 %vm662_vm0, %v661_v1  ;;  %v293_v25 = vld [vmem:[#allocation9 + $0x50] sm:$0xff]  ;;  %v292_v26 = vld [vmem:[#allocation9 + $0x48] sm:$0xff]  ;;  %v291_v27 = vld [vmem:[#allocation9 + $0x40] sm:$0xff]  ;;  %v280_v45 = vstv %s401_s30 }
  0x4b   :  { %457 = vmatpush3.msra.mxu1 %v198_v7  ;;  %486 = vmatpush3.msra.mxu0 %v298_v20  ;;  %v290_v28 = vld [vmem:[#allocation9 + $0x38] sm:$0xff]  ;;  %v289_v29 = vld [vmem:[#allocation9 + $0x30] sm:$0xff]  ;;  %v288_v30 = vld [vmem:[#allocation9 + $0x28] sm:$0xff] }
  0x4c   :  { %458 = vmatprep.subr.mxu1 %v661_v1  ;;  %487 = vmatprep.subr.mxu0 %v661_v1  ;;  %v287_v31 = vld [vmem:[#allocation9 + $0x20] sm:$0xff]  ;;  %v286_v32 = vld [vmem:[#allocation9 + $0x18] sm:$0xff]  ;;  %v402_v33 = vld [vmem:[%s787_s2] ss:$0 sm:$0xff] }
  0x4d   :  { %459 = vmatpush3.msra.mxu1 %v197_v8  ;;  %488 = vmatpush3.msra.mxu0 %v297_v21  ;;  %v285_v40 = vld [vmem:[#allocation9 + $0x10] sm:$0xff]  ;;  %v284_v41 = vld [vmem:[#allocation9 + $0x8] sm:$0xff]  ;;  %v283_v42 = vld [vmem:[#allocation9] sm:$0xff] }
  0x4e   :  { %460 = vmatprep.subr.mxu1 %v661_v1  ;;  %489 = vmatprep.subr.mxu0 %v661_v1  ;;  %v404_v43 = vld [vmem:[%s789_s4] ss:$0 sm:$0xff]  ;;  %s663_s4 = smov [#allocation12]  }
  0x4f   :  { %461 = vmatpush3.msra.mxu1 %v196_v9  ;;  %490 = vmatpush3.msra.mxu0 %v296_v22  ;;  %v405_v50 = vld [vmem:[%s791_s6] ss:$0 sm:$0xff]  ;;  %s389_s12 = sshll.u32 %s663_s4, 4  ;;  %s390_s12 = int_to_ptr.vmem [resolvable:$true] %s389_s12 }
  0x50   :  { %462 = vmatprep.subr.mxu1 %v661_v1  ;;  %491 = vmatprep.subr.mxu0 %v661_v1  ;;  %s624_s13 = scalar_lea.vmem %s390_s12, 128  ;;  %p629_p12 = scmp.lt.s32.totalorder %s390_s12, %s390_s12 }
  0x51   :  { %463 = vmatpush3.msra.mxu1 %v195_v10  ;;  %492 = vmatpush3.msra.mxu0 %v295_v23  ;;  %p625_p11 = scmp.ne.s32.totalorder %s390_s12, %s624_s13  ;;  %p630_p13 = scmp.lt.s32.totalorder %s624_s13, %s624_s13 }
  0x52   :  { %464 = vmatprep.subr.mxu1 %v661_v1  ;;  %493 = vmatprep.subr.mxu0 %v661_v1 }
  0x53   :  { %465 = vmatpush3.msra.mxu1 %v194_v11  ;;  %494 = vmatpush3.msra.mxu0 %v294_v24  ;;  %p631_p0 = por %p630_p13, %p629_p12 }
  0x54   :  { %466 = vmatprep.subr.mxu1 %v661_v1  ;;  %495 = vmatprep.subr.mxu0 %v661_v1 }
  0x55   :  { %467 = vmatpush3.msra.mxu1 %v193_v12  ;;  %496 = vmatpush3.msra.mxu0 %v293_v25  ;;  %p632_p1 = pnand %p631_p0, %p625_p11 }
  0x56   :  { %468 = vmatprep.subr.mxu1 %v661_v1  ;;  %497 = vmatprep.subr.mxu0 %v661_v1 }
  0x57   :  { %469 = vmatpush3.msra.mxu1 %v192_v13  ;;  %498 = vmatpush3.msra.mxu0 %v292_v26 }
  0x58   :  { %470 = vmatprep.subr.mxu1 %v661_v1  ;;  %499 = vmatprep.subr.mxu0 %v661_v1 }
  0x59   :  { %471 = vmatpush3.msra.mxu1 %v191_v14  ;;  %500 = vmatpush3.msra.mxu0 %v291_v27 }
  0x5a   :  { %472 = vmatprep.subr.mxu1 %v661_v1  ;;  %501 = vmatprep.subr.mxu0 %v661_v1 }
  0x5b   :  { %473 = vmatpush3.msra.mxu1 %v190_v15  ;;  %502 = vmatpush3.msra.mxu0 %v290_v28 }
  0x5c   :  { %474 = vmatprep.subr.mxu1 %v661_v1  ;;  %503 = vmatprep.subr.mxu0 %v661_v1 }
  0x5d   :  { %475 = vmatpush3.msra.mxu1 %v189_v16  ;;  %504 = vmatpush3.msra.mxu0 %v289_v29 }
  0x5e   :  { %476 = vmatprep.subr.mxu1 %v661_v1  ;;  %505 = vmatprep.subr.mxu0 %v661_v1 }
  0x5f   :  { %477 = vmatpush3.msra.mxu1 %v188_v17  ;;  %506 = vmatpush3.msra.mxu0 %v288_v30 }
  0x60   :  { %478 = vmatprep.subr.mxu1 %v661_v1  ;;  %507 = vmatprep.subr.mxu0 %v661_v1 }
  0x61   :  { %479 = vmatpush3.msra.mxu1 %v187_v18  ;;  %508 = vmatpush3.msra.mxu0 %v287_v31 }
  0x62   :  { %480 = vmatprep.subr.mxu1 %v661_v1  ;;  %509 = vmatprep.subr.mxu0 %v661_v1 }
  0x63   :  { %481 = vmatpush3.msra.mxu1 %v186_v19  ;;  %510 = vmatpush3.msra.mxu0 %v286_v32 }
  0x64   :  { %511 = vmatprep.subr.mxu0 %v661_v1 }
  0x65   :  { %512 = vmatpush3.msra.mxu0 %v285_v40 }
  0x66   :  { %513 = vmatprep.subr.mxu0 %v661_v1 }
  0x67   :  { %514 = vmatpush3.msra.mxu0 %v284_v41 }
  0x68   :  { %515 = vmatprep.subr.mxu0 %v661_v1 }
  0x69   :  { %516 = vmatpush3.msra.mxu0 %v283_v42 }
 0x107   :  { %v178_v34 = vpop.f32.mrf.mxu0 }
 0x108   :  { %v179_v36 = vadd.f32 %v402_v33, %v178_v34 }
 0x109   :  { %v449_v37 = vpop.f32.mrf.mxu0 }
 0x10a   :  { %v184_v38 = vmul.f32 %v183_v35, %v179_v36  ;;  %vm182_vm2 = vcmp.gt.f32.partialorder %v179_v36, 0.0 }
 0x10c   :  { %v185_v39 = vsel %vm182_vm2, %v179_v36, %v184_v38 }
 0x10d   :  { %483 = vmatmul.mubr.f32.vlgmr.msra.gmra.mxu1 %v185_v39 }
 0x1cd   :  { %v275_v44 = vpop.f32.mrf.mxu1 }
 0x1ce   :  { %v276_v46 = vadd.f32 %v404_v43, %v275_v44 }
 0x1cf   :  { %v484_v47 = vpop.f32.mrf.mxu1 }
 0x1d0   :  { %vm279_vm3 = vcmp.gt.f32.partialorder %v276_v46, 0.0  ;;  %v281_v48 = vmul.f32 %v280_v45, %v276_v46 }
 0x1d2   :  { %v282_v49 = vsel %vm279_vm3, %v276_v46, %v281_v48 }
 0x1d3   :  { %518 = vmatmul.mubr.f32.vlgmr.msra.gmra.mxu0 %v282_v49 }
 0x293   :  { %v372_v51 = vpop.f32.mrf.mxu0 }
 0x294   :  { %v373_v52 = vadd.f32 %v405_v50, %v372_v51 }
 0x295   :  { %v519_v53 = vpop.f32.mrf.mxu0 }
 0x296   :  { %v376_v54 = vmul.f32 %v373_v52, %v373_v52 }
 0x298   :  { %377 = vadd.xlane.f32.xlu0 %v376_v54 }
 0x321   :  { %v378_v55 = vpop.xlane.xlu0 %377 }
 0x322   :  { %v379_v56 = vadd.f32 1e-16, %v378_v55 }
 0x324   :  { %530 = vrsqrt.f32 %v379_v56 }
 0x331   :  { %v531_v57 = vpop.eup %530 }
 0x332   :  { %v381_v58 = vmul.f32 %v531_v57, %v373_v52 }
 0x334   :  { %382 = vst [vmem:[#allocation12] sm:$0xff] %v381_v58 }
 0x335   :  { %635 = shalt.err (!%p632_p1)
}
 0x336   :  { %392 = dma.vmem_to_hbm [thread:$0]  %s390_s12, 128, %s793_s8, [#allocation4]  }
 0x337   :  { %652 = dma.done.wait [#allocation4], 128  }
 0x338   :  { %653 = vsyncadd [#allocation4], 4294967168 }
 0x339   :  { %396 = vsyncpa [#allocation3], 1 }
 0x33a   :  { %397 = vsyncpa [#allocation7], 1 }
 0x33b   :  { %398 = vsyncpa [#allocation10], 1 }
 0x33c   :  { %399 = vsyncpa [#allocation4], 1 }
 0x33d   :  { %400 = vsyncpa [#allocation5], 1 }

</bundles_post_ra>
